<compile_context>
chip_gen: v6e
topology: v6e:2x2x1
jax: 0.10.0
libtpu: 0.0.40
codegen_flags: <defaults>
</compile_context>

<pallas_src>
import functools

import jax
import jax.numpy as jnp
from jax.experimental import pallas as pl
from jax.experimental.pallas import tpu as pltpu

LANE = 128  # TPU lane width
_SUBLANE_BF16 = 16  # bf16 packs 16 rows per vreg


def _round_up(x, m):
    return ((x + m - 1) // m) * m


# --------------------------------------------------------------------------
# Kernel: fused 3-layer MLP on one batch tile.
# --------------------------------------------------------------------------
def _actor_mlp_kernel(x_ref, w1_ref, b1_ref, w2_ref, b2_ref, w3_ref, b3_ref, o_ref):
    cdt = w1_ref.dtype  # bf16 compute dtype for MXU operands
    # fc1 + ReLU (bf16 operands on MXU, f32 accumulate / epilogue)
    x = x_ref[...].astype(cdt)  # in-kernel cast; hides under DMA/MXU slack
    h1 = jnp.dot(x, w1_ref[...], preferred_element_type=jnp.float32)
    h1 = jnp.maximum(h1 + b1_ref[...], 0.0).astype(cdt)
    # fc2 + ReLU
    h2 = jnp.dot(h1, w2_ref[...], preferred_element_type=jnp.float32)
    h2 = jnp.maximum(h2 + b2_ref[...], 0.0).astype(cdt)
    # fc3 (no activation) -- output lanes already padded to a multiple of 128
    out = jnp.dot(h2, w3_ref[...], preferred_element_type=jnp.float32) + b3_ref[...]
    o_ref[...] = out.astype(o_ref.dtype)


# --------------------------------------------------------------------------
# One-time parameter preparation (hoisted out of the hot forward path).
# --------------------------------------------------------------------------
def prepare_params(params, compute_dtype=jnp.bfloat16):
    """Cast weights to the MXU dtype and zero-pad hidden/output dims to 128 lanes.

    Call once; reuse the returned dict for every forward.
    """
    w1, b1 = params["w1"], params["b1"]
    w2, b2 = params["w2"], params["b2"]
    w3, b3 = params["w3"], params["b3"]

    in_size, hidden = w1.shape
    out_size = w3.shape[1]
    hpad = _round_up(max(hidden, LANE), LANE)
    opad = _round_up(max(out_size, LANE), LANE)

    cdt = compute_dtype
    w1p = jnp.zeros((in_size, hpad), cdt).at[:, :hidden].set(w1.astype(cdt))
    b1p = jnp.zeros((1, hpad), jnp.float32).at[:, :hidden].set(b1.astype(jnp.float32))
    w2p = jnp.zeros((hpad, hpad), cdt).at[:hidden, :hidden].set(w2.astype(cdt))
    b2p = jnp.zeros((1, hpad), jnp.float32).at[:, :hidden].set(b2.astype(jnp.float32))
    w3p = jnp.zeros((hpad, opad), cdt).at[:hidden, :out_size].set(w3.astype(cdt))
    b3p = jnp.zeros((1, opad), jnp.float32).at[:, :out_size].set(b3.astype(jnp.float32))

    # Guard: these weights are held fully VMEM-resident (double-buffered).
    weight_bytes = (w1p.size + w2p.size + w3p.size) * jnp.dtype(cdt).itemsize
    assert 2 * weight_bytes < 24 * 1024 * 1024, (
        "hidden too large for VMEM-resident weights; add a K/N-tiled path")

    return {
        "w1": w1p, "b1": b1p, "w2": w2p, "b2": b2p, "w3": w3p, "b3": b3p,
        "in_size": in_size, "hidden": hidden, "out_size": out_size,
        "hpad": hpad, "opad": opad,
    }


def _pick_batch_tiling(batch, block_m):
    """Choose (tm, padded_batch, n_steps): tm multiple of 16, small padding
    overshoot, and >= 2 grid steps when the batch allows (v7x megacore)."""
    padded16 = _round_up(batch, _SUBLANE_BF16)
    max_tm = min(block_m, padded16)
    min_steps = 2 if padded16 >= 2 * _SUBLANE_BF16 else 1
    n_steps = max(min_steps, -(-padded16 // max_tm))
    tm = _round_up(-(-padded16 // n_steps), _SUBLANE_BF16)
    n_steps = -(-padded16 // tm)
    return tm, n_steps * tm, n_steps


def _vmem_limit_bytes(tm, in_size, hpad, opad, out_bytes):
    """Budget scoped VMEM from the actual tiles (double-buffered) + headroom."""
    x_tile = tm * in_size * 4                      # f32 input tile
    o_tile = tm * opad * out_bytes                 # output tile
    weights = (in_size * hpad + hpad * hpad + hpad * opad) * 2   # bf16
    biases = (2 * hpad + opad) * 4
    act = 2 * tm * hpad * 4                        # h1/h2 f32 working set
    need = 2 * (x_tile + o_tile + weights + biases) + act + (8 << 20)
    return min(_round_up(need, 1 << 20), 64 << 20)


# --------------------------------------------------------------------------
# Forward wrapper (hot path: only x is touched outside the kernel).
# --------------------------------------------------------------------------
def actor_network_forward(x, prepared, *, block_m=512, out_dtype=jnp.float32):
    """Fused 3-layer MLP forward.

    x: (batch, input_size) float32
    prepared: result of prepare_params().  out_dtype=bf16 halves output HBM
    writeback (recommended on v5e); the wrapper slices/casts back either way.
    """
    batch, in_size = x.shape
    assert in_size == prepared["in_size"]
    hpad, opad, out_size = prepared["hpad"], prepared["opad"], prepared["out_size"]

    tm, padded_batch, n_steps = _pick_batch_tiling(batch, block_m)
    if padded_batch != batch:
        x = jnp.pad(x, ((0, padded_batch - batch), (0, 0)))

    const2d = pl.BlockSpec(None, None)  # placeholder, replaced below per-array

    def full_spec(a):
        return pl.BlockSpec(a.shape, lambda i: (0, 0))

    w1p, b1p = prepared["w1"], prepared["b1"]
    w2p, b2p = prepared["w2"], prepared["b2"]
    w3p, b3p = prepared["w3"], prepared["b3"]

    out = pl.pallas_call(
        _actor_mlp_kernel,
        out_shape=jax.ShapeDtypeStruct((padded_batch, opad), out_dtype),
        grid=(n_steps,),
        in_specs=[
            pl.BlockSpec((tm, in_size), lambda i: (i, 0)),   # x: batch-tiled
            full_spec(w1p), full_spec(b1p),                  # weights/biases:
            full_spec(w2p), full_spec(b2p),                  # constant index_map
            full_spec(w3p), full_spec(b3p),                  # -> VMEM-resident
        ],
        out_specs=pl.BlockSpec((tm, opad), lambda i: (i, 0)),  # lane-dense vst
        compiler_params=pltpu.CompilerParams(
            dimension_semantics=("parallel",),               # megacore split on v7x
            vmem_limit_bytes=_vmem_limit_bytes(
                tm, in_size, hpad, opad, jnp.dtype(out_dtype).itemsize),
        ),
    )(x, w1p, b1p, w2p, b2p, w3p, b3p)

    # Slice away batch padding and lane padding; restore f32.
    return out[:batch, :out_size].astype(jnp.float32)


# --------------------------------------------------------------------------
# Init + reference (torch.nn.Linear-style init, matching bf16 operand rounding)
# --------------------------------------------------------------------------
def init_actor_params(key, input_size, hidden_size, output_size, dtype=jnp.float32):
    ks = jax.random.split(key, 6)

    def linear(kw, kb, fan_in, fan_out):
        bound = 1.0 / jnp.sqrt(jnp.asarray(fan_in, dtype))
        w = jax.random.uniform(kw, (fan_in, fan_out), dtype, -bound, bound)  # (in,out)
        b = jax.random.uniform(kb, (1, fan_out), dtype, -bound, bound)
        return w, b

    w1, b1 = linear(ks[0], ks[1], input_size, hidden_size)
    w2, b2 = linear(ks[2], ks[3], hidden_size, hidden_size)
    w3, b3 = linear(ks[4], ks[5], hidden_size, output_size)
    return {"w1": w1, "b1": b1, "w2": w2, "b2": b2, "w3": w3, "b3": b3}


def _reference_forward(x, p, compute_dtype=jnp.bfloat16):
    cast = lambda a: a.astype(compute_dtype).astype(jnp.float32)
    h1 = jnp.maximum(cast(x) @ cast(p["w1"]) + p["b1"], 0.0)
    h2 = jnp.maximum(cast(h1) @ cast(p["w2"]) + p["b2"], 0.0)
    return cast(h2) @ cast(p["w3"]) + p["b3"]


if __name__ == "__main__":
    input_size, hidden_size, output_size = 4, 32, 2

    key = jax.random.PRNGKey(0)
    kx1, kx2, kp = jax.random.split(key, 3)
    params = init_actor_params(kp, input_size, hidden_size, output_size)
    prepared = prepare_params(params)  # one-time weight cast + lane padding

    # Case 1: small aligned batch (single grid step).
    x1 = jax.random.normal(kx1, (8, input_size), jnp.float32)
    out1 = jax.block_until_ready(actor_network_forward(x1, prepared))
    ref1 = _reference_forward(x1, params)
    assert out1.shape == (8, output_size)
    assert jnp.allclose(out1, ref1, atol=1e-2, rtol=1e-2)

    # Case 2: ragged batch (exercises padding, 2 grid steps / megacore path).
    x2 = jax.random.normal(kx2, (37, input_size), jnp.float32)
    out2 = jax.block_until_ready(actor_network_forward(x2, prepared))
    ref2 = _reference_forward(x2, params)
    assert out2.shape == (37, output_size)
    assert jnp.allclose(out2, ref2, atol=1e-2, rtol=1e-2)

    # Case 3: bf16 output path (v5e HBM-writeback option).
    out3 = jax.block_until_ready(
        actor_network_forward(x2, prepared, out_dtype=jnp.bfloat16))
    assert out3.shape == (37, output_size)
    assert jnp.allclose(out3, ref2, atol=3e-2, rtol=3e-2)

    print("KERNEL_OK")
</pallas_src>

<mosaic_0001>
module attributes {stable_mosaic.version = 11 : i64} {
  func.func @_actor_mlp_kernel(%arg0: i32, %arg1: memref<16x4xf32, #tpu.memory_space<vmem>>, %arg2: memref<4x128xbf16, #tpu.memory_space<vmem>>, %arg3: memref<1x128xf32, #tpu.memory_space<vmem>>, %arg4: memref<128x128xbf16, #tpu.memory_space<vmem>>, %arg5: memref<1x128xf32, #tpu.memory_space<vmem>>, %arg6: memref<128x128xbf16, #tpu.memory_space<vmem>>, %arg7: memref<1x128xf32, #tpu.memory_space<vmem>>, %arg8: memref<16x128xf32, #tpu.memory_space<vmem>>) attributes {dimension_semantics = [#tpu.dimension_semantics<parallel>], iteration_bounds = array<i64: 1>, scalar_prefetch = 0 : i64, scratch_operands = 0 : i64, tpu.core_type = #tpu.core_type<tc>, window_params = [{transform_indices = @transform_0, window_bounds = array<i64: 16, 4>}, {pipeline_mode = #tpu.pipeline_mode<synchronous>, transform_indices = @transform_1, window_bounds = array<i64: 4, 128>}, {pipeline_mode = #tpu.pipeline_mode<synchronous>, transform_indices = @transform_2, window_bounds = array<i64: 1, 128>}, {pipeline_mode = #tpu.pipeline_mode<synchronous>, transform_indices = @transform_3, window_bounds = array<i64: 128, 128>}, {pipeline_mode = #tpu.pipeline_mode<synchronous>, transform_indices = @transform_4, window_bounds = array<i64: 1, 128>}, {pipeline_mode = #tpu.pipeline_mode<synchronous>, transform_indices = @transform_5, window_bounds = array<i64: 128, 128>}, {pipeline_mode = #tpu.pipeline_mode<synchronous>, transform_indices = @transform_6, window_bounds = array<i64: 1, 128>}, {transform_indices = @transform_7, window_bounds = array<i64: 16, 128>}]} {
    %c0 = arith.constant 0 : index
    %c0_0 = arith.constant 0 : index
    %0 = vector.load %arg1[%c0, %c0_0] : memref<16x4xf32, #tpu.memory_space<vmem>>, vector<16x4xf32>
    %1 = arith.truncf %0 : vector<16x4xf32> to vector<16x4xbf16>
    %c0_1 = arith.constant 0 : index
    %c0_2 = arith.constant 0 : index
    %2 = vector.load %arg2[%c0_1, %c0_2] : memref<4x128xbf16, #tpu.memory_space<vmem>>, vector<4x128xbf16>
    %cst = arith.constant dense<0.000000e+00> : vector<16x128xf32>
    %3 = tpu.matmul %1, %2, %cst {dimension_numbers = #tpu.dot_dimension_numbers<[1], [0], [0], [1], [0, 0, 1, 1], [], []>} : vector<16x4xbf16>, vector<4x128xbf16>, vector<16x128xf32> -> vector<16x128xf32>
    %c0_3 = arith.constant 0 : index
    %c0_4 = arith.constant 0 : index
    %4 = vector.load %arg3[%c0_3, %c0_4] : memref<1x128xf32, #tpu.memory_space<vmem>>, vector<1x128xf32>
    %5 = vector.broadcast %4 : vector<1x128xf32> to vector<16x128xf32>
    %6 = arith.addf %3, %5 : vector<16x128xf32>
    %cst_5 = arith.constant 0.000000e+00 : f32
    %7 = vector.broadcast %cst_5 : f32 to vector<16x128xf32>
    %8 = arith.maximumf %6, %7 : vector<16x128xf32>
    %9 = arith.truncf %8 : vector<16x128xf32> to vector<16x128xbf16>
    %c0_6 = arith.constant 0 : index
    %c0_7 = arith.constant 0 : index
    %10 = vector.load %arg4[%c0_6, %c0_7] : memref<128x128xbf16, #tpu.memory_space<vmem>>, vector<128x128xbf16>
    %cst_8 = arith.constant dense<0.000000e+00> : vector<16x128xf32>
    %11 = tpu.matmul %9, %10, %cst_8 {dimension_numbers = #tpu.dot_dimension_numbers<[1], [0], [0], [1], [0, 0, 1, 1], [], []>} : vector<16x128xbf16>, vector<128x128xbf16>, vector<16x128xf32> -> vector<16x128xf32>
    %c0_9 = arith.constant 0 : index
    %c0_10 = arith.constant 0 : index
    %12 = vector.load %arg5[%c0_9, %c0_10] : memref<1x128xf32, #tpu.memory_space<vmem>>, vector<1x128xf32>
    %13 = vector.broadcast %12 : vector<1x128xf32> to vector<16x128xf32>
    %14 = arith.addf %11, %13 : vector<16x128xf32>
    %cst_11 = arith.constant 0.000000e+00 : f32
    %15 = vector.broadcast %cst_11 : f32 to vector<16x128xf32>
    %16 = arith.maximumf %14, %15 : vector<16x128xf32>
    %17 = arith.truncf %16 : vector<16x128xf32> to vector<16x128xbf16>
    %c0_12 = arith.constant 0 : index
    %c0_13 = arith.constant 0 : index
    %18 = vector.load %arg6[%c0_12, %c0_13] : memref<128x128xbf16, #tpu.memory_space<vmem>>, vector<128x128xbf16>
    %cst_14 = arith.constant dense<0.000000e+00> : vector<16x128xf32>
    %19 = tpu.matmul %17, %18, %cst_14 {dimension_numbers = #tpu.dot_dimension_numbers<[1], [0], [0], [1], [0, 0, 1, 1], [], []>} : vector<16x128xbf16>, vector<128x128xbf16>, vector<16x128xf32> -> vector<16x128xf32>
    %c0_15 = arith.constant 0 : index
    %c0_16 = arith.constant 0 : index
    %20 = vector.load %arg7[%c0_15, %c0_16] : memref<1x128xf32, #tpu.memory_space<vmem>>, vector<1x128xf32>
    %21 = vector.broadcast %20 : vector<1x128xf32> to vector<16x128xf32>
    %22 = arith.addf %19, %21 : vector<16x128xf32>
    %c0_17 = arith.constant 0 : index
    %c0_18 = arith.constant 0 : index
    %23 = vector.load %arg8[%c0_17, %c0_18] : memref<16x128xf32, #tpu.memory_space<vmem>>, vector<16x128xf32>
    tpu.vector_store %arg8[%c0_17, %c0_18], %22 {strides = array<i32>} : memref<16x128xf32, #tpu.memory_space<vmem>>, vector<16x128xf32>,
    return
  }
  func.func @transform_0(%arg0: i32) -> (i32, i32) {
    %c0_i32 = arith.constant 0 : i32
    %c0_i32_0 = arith.constant 0 : i32
    return %arg0, %c0_i32 : i32, i32
  }
  func.func @transform_1(%arg0: i32) -> (i32, i32) {
    %c0_i32 = arith.constant 0 : i32
    %c0_i32_0 = arith.constant 0 : i32
    %c0_i32_1 = arith.constant 0 : i32
    return %c0_i32, %c0_i32_0 : i32, i32
  }
  func.func @transform_2(%arg0: i32) -> (i32, i32) {
    %c0_i32 = arith.constant 0 : i32
    %c0_i32_0 = arith.constant 0 : i32
    %c0_i32_1 = arith.constant 0 : i32
    return %c0_i32, %c0_i32_0 : i32, i32
  }
  func.func @transform_3(%arg0: i32) -> (i32, i32) {
    %c0_i32 = arith.constant 0 : i32
    %c0_i32_0 = arith.constant 0 : i32
    %c0_i32_1 = arith.constant 0 : i32
    return %c0_i32, %c0_i32_0 : i32, i32
  }
  func.func @transform_4(%arg0: i32) -> (i32, i32) {
    %c0_i32 = arith.constant 0 : i32
    %c0_i32_0 = arith.constant 0 : i32
    %c0_i32_1 = arith.constant 0 : i32
    return %c0_i32, %c0_i32_0 : i32, i32
  }
  func.func @transform_5(%arg0: i32) -> (i32, i32) {
    %c0_i32 = arith.constant 0 : i32
    %c0_i32_0 = arith.constant 0 : i32
    %c0_i32_1 = arith.constant 0 : i32
    return %c0_i32, %c0_i32_0 : i32, i32
  }
  func.func @transform_6(%arg0: i32) -> (i32, i32) {
    %c0_i32 = arith.constant 0 : i32
    %c0_i32_0 = arith.constant 0 : i32
    %c0_i32_1 = arith.constant 0 : i32
    return %c0_i32, %c0_i32_0 : i32, i32
  }
  func.func @transform_7(%arg0: i32) -> (i32, i32) {
    %c0_i32 = arith.constant 0 : i32
    %c0_i32_0 = arith.constant 0 : i32
    return %arg0, %c0_i32 : i32, i32
  }
}

</mosaic_0001>

<bundles_post_ra>
// kernel: tpu_custom_call.1
= control target key start
LH: loop header
LB: loop body
LE: loop exit
PB: predicated region body
PF: predicated region fallthrough
CT: control target
= control target key end

     0   :  { %12 = vsyncpa [#allocation3], 0  ;;  %s642_s0 = inlined_call_operand.vmem [shape: f32[16,4], index: 0, kind: input, shape index: {}]   ;;  %s643_s1 = inlined_call_operand.vmem [shape: bf16[4,128], index: 1, kind: input, shape index: {}]   ;;  %s644_s2 = inlined_call_operand.vmem [shape: f32[1,128], index: 2, kind: input, shape index: {}]   ;;  %s645_s3 = inlined_call_operand.hbm [shape: bf16[128,128], index: 3, kind: input, shape index: {}]   ;;  %s646_s4 = inlined_call_operand.vmem [shape: f32[1,128], index: 4, kind: input, shape index: {}]   ;;  %s647_s5 = inlined_call_operand.hbm [shape: bf16[128,128], index: 5, kind: input, shape index: {}]   ;;  %s648_s6 = inlined_call_operand.vmem [shape: f32[1,128], index: 6, kind: input, shape index: {}]   ;;  %s649_s7 = inlined_call_operand.hbm [shape: f32[16,128], index: 7, kind: output, shape index: {}]  }
   0x1   :  { %13 = vsyncpa [#allocation6], 0 }
   0x2   :  { %14 = vsyncpa [#allocation4], 0  ;;  %s543_s24 = smov [#allocation2]  }
   0x3   :  { %s26_s25 = sshll.u32 %s543_s24, 4  ;;  %s27_s25 = int_to_ptr.vmem [resolvable:$true] %s26_s25 }
   0x4   :  { %s485_s26 = scalar_lea.vmem %s27_s25, 1024  ;;  %p490_p1 = scmp.lt.s32.totalorder %s27_s25, %s27_s25 }
   0x5   :  { %p486_p0 = scmp.ne.s32.totalorder %s27_s25, %s485_s26  ;;  %p491_p2 = scmp.lt.s32.totalorder %s485_s26, %s485_s26 }
   0x7   :  { %p492_p3 = por %p491_p2, %p490_p1 }
   0x9   :  { %p493_p4 = pnand %p492_p3, %p486_p0 }
   0xb   :  { %496 = shalt.err (!%p493_p4)
}
   0xc   :  { %s544_s27 = smov 64   ;;  %s545_s28 = smov 4  }
   0xd   :  { %32 = dma.hbm_to_vmem [thread:$0]  %s645_s3, 1024, %s27_s25, [#allocation3], %s544_s27, %s544_s27, %s545_s28  }
   0xe   :  { %s546_s8 = smov [#allocation5]  }
   0xf   :  { %s40_s9 = sshll.u32 %s546_s8, 4  ;;  %s41_s9 = int_to_ptr.vmem [resolvable:$true] %s40_s9 }
  0x10   :  { %s505_s10 = scalar_lea.vmem %s41_s9, 1024  ;;  %p510_p6 = scmp.lt.s32.totalorder %s41_s9, %s41_s9 }
  0x11   :  { %p506_p5 = scmp.ne.s32.totalorder %s41_s9, %s505_s10  ;;  %p511_p7 = scmp.lt.s32.totalorder %s505_s10, %s505_s10 }
  0x13   :  { %p512_p8 = por %p511_p7, %p510_p6 }
  0x15   :  { %p513_p9 = pnand %p512_p8, %p506_p5 }
  0x17   :  { %516 = shalt.err (!%p513_p9)
}
  0x18   :  { %46 = dma.hbm_to_vmem [thread:$0]  %s647_s5, 1024, %s41_s9, [#allocation6], %s544_s27, %s544_s27, %s545_s28  }
  0x19   :  { %537 = dma.done.wait [#allocation3], 1024  }
  0x1a   :  { %538 = vsyncadd [#allocation3], 4294966272 }
  0x1b   :  { %539 = dma.done.wait [#allocation6], 1024  }
  0x1c   :  { %540 = vsyncadd [#allocation6], 4294966272  ;;  %v547_v0 = vmov 0.0   ;;  %vm548_vm0 = vmmov 0   ;;  %vm71_vm1 = vcmask 1041408   ;;  %v56_v2 = vld [vmem:[%s642_s0] sm:$0xff] }
  0x1d   :  { %406 = vmatprep.subr.bf16.mxu0 %v547_v0  ;;  %408 = vmatprep.mubr.msk.bf16.mxu0 %vm548_vm0, %v547_v0  ;;  %v59_v1 = vld [vmem:[%s643_s1] sm:$0x3]  ;;  %v57_v3 = vld [vmem:[%s642_s0 + $0x8] sm:$0xff]  ;;  %v461_v6 = vld [vmem:[#allocation2 + $0x38] sm:$0xff]   ;;  %vm67_vm2 = vcmask 31744   ;;  %s549_s20 = smov [#allocation7]  }
  0x1e   :  { %412 = vmatprep.subr.bf16.mxu1 %v547_v0  ;;  %428 = vmatprep.mubr.msk.bf16.mxu1 %vm548_vm0, %v547_v0  ;;  %v73_v4 = vsel %vm71_vm1, %v59_v1, 0  ;;  %v58_v5 = vpack.c.bf16 %v57_v3, %v56_v2  ;;  %v462_v7 = vld [vmem:[#allocation2 + $0x30] sm:$0xff]   ;;  %v463_v8 = vld [vmem:[#allocation2 + $0x28] sm:$0xff]   ;;  %v464_v9 = vld [vmem:[#allocation2 + $0x20] sm:$0xff]   ;;  %s353_s21 = sshll.u32 %s549_s20, 4  ;;  %s354_s21 = int_to_ptr.vmem [resolvable:$true] %s353_s21 }
  0x1f   :  { %407 = vmatpush3.bf16.msra.mxu0 %v73_v4  ;;  %413 = vmatpush3.bf16.msra.mxu1 %v461_v6  ;;  %v465_v10 = vld [vmem:[#allocation2 + $0x18] sm:$0xff]   ;;  %v466_v11 = vld [vmem:[#allocation2 + $0x10] sm:$0xff]   ;;  %v467_v12 = vld [vmem:[#allocation2 + $0x8] sm:$0xff]   ;;  %p522_p11 = scmp.lt.s32.totalorder %s354_s21, %s354_s21 }
  0x20   :  { %432 = vmatprep.subr.bf16.mxu0 %v547_v0  ;;  %414 = vmatprep.subr.bf16.mxu1 %v547_v0  ;;  %v468_v13 = vld [vmem:[#allocation2] sm:$0xff]   ;;  %v469_v14 = vld [vmem:[#allocation5 + $0x38] sm:$0xff]   ;;  %v470_v15 = vld [vmem:[#allocation5 + $0x30] sm:$0xff]  }
  0x21   :  { %v471_v16 = vld [vmem:[#allocation5 + $0x28] sm:$0xff]   ;;  %v472_v17 = vld [vmem:[#allocation5 + $0x20] sm:$0xff]   ;;  %v473_v18 = vld [vmem:[#allocation5 + $0x18] sm:$0xff]  }
  0x22   :  { %409 = vmatmul.mubr.msk.bf16.vlgmr.msra.gmra.mxu0 %vm67_vm2, %v58_v5  ;;  %v366_v19 = vld [vmem:[%s644_s2] ss:$0 sm:$0xff]  ;;  %v474_v29 = vld [vmem:[#allocation5 + $0x10] sm:$0xff]   ;;  %v475_v30 = vld [vmem:[#allocation5 + $0x8] sm:$0xff]  }
  0x23   :  { %448 = vmatprep.mubr.msk.bf16.mxu0 %vm548_vm0, %v547_v0  ;;  %415 = vmatpush3.bf16.msra.mxu1 %v462_v7  ;;  %v476_v31 = vld [vmem:[#allocation5] sm:$0xff]  }
  0x24   :  { %416 = vmatprep.subr.bf16.mxu1 %v547_v0  ;;  %433 = vmatpush3.bf16.msra.mxu0 %v469_v14  ;;  %v368_v32 = vld [vmem:[%s646_s4] ss:$0 sm:$0xff]  ;;  %s517_s4 = scalar_lea.vmem %s354_s21, 256 }
  0x25   :  { %434 = vmatprep.subr.bf16.mxu0 %v547_v0  ;;  %v377_v42 = vld [vmem:[%s648_s6] ss:$0 sm:$0xff]  ;;  %p518_p10 = scmp.ne.s32.totalorder %s354_s21, %s517_s4  ;;  %p523_p12 = scmp.lt.s32.totalorder %s517_s4, %s517_s4 }
  0x27   :  { %417 = vmatpush3.bf16.msra.mxu1 %v463_v8  ;;  %p524_p13 = por %p523_p12, %p522_p11 }
  0x28   :  { %418 = vmatprep.subr.bf16.mxu1 %v547_v0  ;;  %435 = vmatpush3.bf16.msra.mxu0 %v470_v15 }
  0x29   :  { %436 = vmatprep.subr.bf16.mxu0 %v547_v0  ;;  %p525_p0 = pnand %p524_p13, %p518_p10 }
  0x2b   :  { %419 = vmatpush3.bf16.msra.mxu1 %v464_v9 }
  0x2c   :  { %420 = vmatprep.subr.bf16.mxu1 %v547_v0  ;;  %437 = vmatpush3.bf16.msra.mxu0 %v471_v16 }
  0x2d   :  { %438 = vmatprep.subr.bf16.mxu0 %v547_v0 }
  0x2f   :  { %421 = vmatpush3.bf16.msra.mxu1 %v465_v10 }
  0x30   :  { %422 = vmatprep.subr.bf16.mxu1 %v547_v0  ;;  %439 = vmatpush3.bf16.msra.mxu0 %v472_v17 }
  0x31   :  { %440 = vmatprep.subr.bf16.mxu0 %v547_v0 }
  0x33   :  { %423 = vmatpush3.bf16.msra.mxu1 %v466_v11 }
  0x34   :  { %424 = vmatprep.subr.bf16.mxu1 %v547_v0  ;;  %441 = vmatpush3.bf16.msra.mxu0 %v473_v18 }
  0x35   :  { %442 = vmatprep.subr.bf16.mxu0 %v547_v0 }
  0x37   :  { %425 = vmatpush3.bf16.msra.mxu1 %v467_v12 }
  0x38   :  { %426 = vmatprep.subr.bf16.mxu1 %v547_v0  ;;  %443 = vmatpush3.bf16.msra.mxu0 %v474_v29 }
  0x39   :  { %444 = vmatprep.subr.bf16.mxu0 %v547_v0 }
  0x3b   :  { %427 = vmatpush3.bf16.msra.mxu1 %v468_v13 }
  0x3c   :  { %445 = vmatpush3.bf16.msra.mxu0 %v475_v30 }
  0x3d   :  { %446 = vmatprep.subr.bf16.mxu0 %v547_v0 }
  0x40   :  { %447 = vmatpush3.bf16.msra.mxu0 %v476_v31 }
  0xe2   :  { %v109_v20 = vpop.f32.mrf.mxu0 }
  0xe3   :  { %v110_v22 = vadd.f32 %v366_v19, %v109_v20 }
  0xe4   :  { %v410_v21 = vpop.f32.mrf.mxu0 }
  0xe5   :  { %v116_v26 = vmax.f32 %v110_v22, 0.0 }
  0xe6   :  { %v112_v23 = vpop.f32.mrf.mxu0 }
  0xe7   :  { %v113_v24 = vadd.f32 %v366_v19, %v112_v23 }
  0xe8   :  { %v411_v25 = vpop.f32.mrf.mxu0 }
  0xe9   :  { %v117_v27 = vmax.f32 %v113_v24, 0.0 }
  0xeb   :  { %v118_v28 = vpack.c.bf16 %v117_v27, %v116_v26 }
  0xed   :  { %429 = vmatmul.mubr.bf16.vlgmr.msra.gmra.mxu1 %v118_v28 }
 0x1ad   :  { %v224_v33 = vpop.f32.mrf.mxu1 }
 0x1ae   :  { %v225_v35 = vadd.f32 %v368_v32, %v224_v33 }
 0x1af   :  { %v430_v34 = vpop.f32.mrf.mxu1 }
 0x1b0   :  { %v231_v39 = vmax.f32 %v225_v35, 0.0 }
 0x1b1   :  { %v227_v36 = vpop.f32.mrf.mxu1 }
 0x1b2   :  { %v228_v37 = vadd.f32 %v368_v32, %v227_v36 }
 0x1b3   :  { %v431_v38 = vpop.f32.mrf.mxu1 }
 0x1b4   :  { %v232_v40 = vmax.f32 %v228_v37, 0.0 }
 0x1b6   :  { %v233_v41 = vpack.c.bf16 %v232_v40, %v231_v39 }
 0x1b8   :  { %449 = vmatmul.mubr.bf16.vlgmr.msra.gmra.mxu0 %v233_v41 }
 0x278   :  { %v339_v43 = vpop.f32.mrf.mxu0 }
 0x279   :  { %v340_v44 = vadd.f32 %v377_v42, %v339_v43 }
 0x27a   :  { %v450_v45 = vpop.f32.mrf.mxu0 }
 0x27b   :  { %346 = vst [vmem:[#allocation7] sm:$0xff] %v340_v44 }
 0x27c   :  { %v342_v46 = vpop.f32.mrf.mxu0 }
 0x27d   :  { %v343_v47 = vadd.f32 %v377_v42, %v342_v46 }
 0x27e   :  { %v451_v48 = vpop.f32.mrf.mxu0 }
 0x27f   :  { %347 = vst [vmem:[#allocation7 + $0x8] sm:$0xff] %v343_v47 }
 0x280   :  { %528 = shalt.err (!%p525_p0)
}
 0x281   :  { %s550_s22 = smov 128   ;;  %s551_s6 = smov 8  }
 0x282   :  { %359 = dma.vmem_to_hbm [thread:$0]  %s354_s21, 256, %s649_s7, [#allocation4], %s550_s22, %s550_s22, %s551_s6  }
 0x283   :  { %541 = dma.done.wait [#allocation4], 256  }
 0x284   :  { %542 = vsyncadd [#allocation4], 4294967040 }
 0x285   :  { %363 = vsyncpa [#allocation3], 1 }
 0x286   :  { %364 = vsyncpa [#allocation6], 1 }
 0x287   :  { %365 = vsyncpa [#allocation4], 1 }

</bundles_post_ra>
